<compile_context>
chip_gen: v7x
topology: tpu7x:2x2x1
jax: 0.10.0
libtpu: 0.0.40
codegen_flags: <defaults>
</compile_context>

<pallas_src>
import jax
import jax.numpy as jnp
from jax.experimental import pallas as pl
from jax.experimental.pallas import tpu as pltpu

# rrelu inference slope: mean of the default bounds lower=1/8, upper=1/3.
RRELU_SLOPE = (1.0 / 8.0 + 1.0 / 3.0) / 2.0  # = 11/48


def _rrelu(x):
    return jnp.where(x >= 0, x, x * RRELU_SLOPE)


def mlp_kernel(x_ref, w1_ref, b1_ref, w2_ref, b2_ref, o_ref):
    # Hidden layer on the MXU: (TB, IN) @ (IN, H), f32 accumulation regardless
    # of operand dtype; bias + rrelu in f32 on the VPU.
    h = jnp.dot(x_ref[...], w1_ref[...], preferred_element_type=jnp.float32)
    h = _rrelu(h + b1_ref[...])                      # (TB, H) f32

    # Output layer (out_features == 1): VPU multiply + XLU lane reduction
    # instead of an N=1 MXU matmul.  w2 is passed as a (1, H) row.
    o = jnp.sum(h * w2_ref[...], axis=-1)            # (TB,)
    o = _rrelu(o[None, :] + b2_ref[...])             # (1, TB) lane-dense row
    o_ref[...] = o.astype(o_ref.dtype)


def mlp_1layer_forward(x, w1, b1, w2, b2, *, batch_tile=None, mxu_dtype=None):
    """x: (B, IN); w1: (IN, H); b1: (H,); w2: (H, 1); b2: (1,) -> (B, 1).

    mxu_dtype: optionally cast x / W1 (MXU operands) to e.g. jnp.bfloat16 on
    v6e/v7x; accumulation, bias-add and rrelu stay in f32.
    """
    B, IN = x.shape
    H = w1.shape[1]
    out_dtype = x.dtype

    # Pick a batch tile that keeps the grid multi-step (pipelining / megacore)
    # without blowing VMEM.  ~512 f32 rows is a good starting point; sweep for
    # large models, and size against 64 MiB VMEM on v7x.
    if batch_tile is None:
        batch_tile = min(B, 512)
        if B % batch_tile != 0:
            batch_tile = B  # fallback for small/odd batches
    assert B % batch_tile == 0
    num_tiles = B // batch_tile

    if mxu_dtype is not None:
        x_mm = x.astype(mxu_dtype)
        w1_mm = w1.astype(mxu_dtype)
    else:
        x_mm, w1_mm = x, w1

    # Small params in f32 for the elementwise path (keeps v5e VPU/EUP happy).
    b1_row = b1.reshape(1, H).astype(jnp.float32)
    w2_row = w2.reshape(1, H).astype(jnp.float32)   # (H, 1) -> (1, H) row
    b2_sc = b2.reshape(1, 1).astype(jnp.float32)

    flops = 2 * B * IN * H + 2 * B * H
    bytes_accessed = (
        x_mm.size * x_mm.dtype.itemsize
        + w1_mm.size * w1_mm.dtype.itemsize
        + (2 * H + 1) * 4
        + B * jnp.dtype(out_dtype).itemsize
    )

    out = pl.pallas_call(
        mlp_kernel,
        out_shape=jax.ShapeDtypeStruct((num_tiles, batch_tile), out_dtype),
        grid=(num_tiles,),
        in_specs=[
            pl.BlockSpec((batch_tile, IN), lambda i: (i, 0)),  # x tile (streamed)
            pl.BlockSpec((IN, H), lambda i: (0, 0)),           # W1 (resident)
            pl.BlockSpec((1, H), lambda i: (0, 0)),            # b1
            pl.BlockSpec((1, H), lambda i: (0, 0)),            # W2 row
            pl.BlockSpec((1, 1), lambda i: (0, 0)),            # b2
        ],
        # Lane-dense output block: last dim = batch_tile.
        out_specs=pl.BlockSpec((1, batch_tile), lambda i: (i, 0)),
        compiler_params=pltpu.CompilerParams(
            dimension_semantics=("parallel",)
        ),
        cost_estimate=pl.CostEstimate(
            flops=flops, transcendentals=0, bytes_accessed=bytes_accessed
        ),
    )(x_mm, w1_mm, b1_row, w2_row, b2_sc)

    # (num_tiles, batch_tile) row-major -> (B, 1), matching the PyTorch module.
    return out.reshape(B, 1)


if __name__ == "__main__":
    # Small shapes consistent with the module: batch=8, input_size=32, hl_num=32.
    B, IN, H = 8, 32, 32
    key = jax.random.PRNGKey(0)
    kx, kw1, kb1, kw2, kb2 = jax.random.split(key, 5)

    x = jax.random.normal(kx, (B, IN), dtype=jnp.float32)

    # Deterministic init mimicking nn.Linear's U(-1/sqrt(fan_in), +1/sqrt(fan_in)),
    # stored as (in_features, out_features) for direct x @ W.
    bound1 = 1.0 / (IN ** 0.5)
    w1 = jax.random.uniform(kw1, (IN, H), jnp.float32, -bound1, bound1)
    b1 = jax.random.uniform(kb1, (H,), jnp.float32, -bound1, bound1)
    bound2 = 1.0 / (H ** 0.5)
    w2 = jax.random.uniform(kw2, (H, 1), jnp.float32, -bound2, bound2)
    b2 = jax.random.uniform(kb2, (1,), jnp.float32, -bound2, bound2)

    out = mlp_1layer_forward(x, w1, b1, w2, b2)
    out = jax.block_until_ready(out)

    # Reference check in plain JAX (same rrelu inference semantics).
    h_expected = _rrelu(x @ w1 + b1[None, :])
    o_expected = _rrelu(h_expected @ w2 + b2[None, :])
    assert out.shape == (B, 1)
    assert jnp.allclose(out, o_expected, atol=1e-5, rtol=1e-5)

    # TODO(synk): F.rrelu training-mode (random per-element slopes) is not
    # implemented; inference-mode fixed slope only, matching module eval().

    print("KERNEL_OK")
</pallas_src>

<mosaic_0001>
module attributes {stable_mosaic.version = 11 : i64} {
  func.func @mlp_kernel(%arg0: i32, %arg1: memref<8x32xf32, #tpu.memory_space<vmem>>, %arg2: memref<32x32xf32, #tpu.memory_space<vmem>>, %arg3: memref<1x32xf32, #tpu.memory_space<vmem>>, %arg4: memref<1x32xf32, #tpu.memory_space<vmem>>, %arg5: memref<1x1xf32, #tpu.memory_space<vmem>>, %arg6: memref<1x8xf32, #tpu.memory_space<vmem>>) attributes {dimension_semantics = [#tpu.dimension_semantics<parallel>], iteration_bounds = array<i64: 1>, scalar_prefetch = 0 : i64, scratch_operands = 0 : i64, tpu.core_type = #tpu.core_type<tc>, window_params = [{transform_indices = @transform_0, window_bounds = array<i64: 8, 32>}, {pipeline_mode = #tpu.pipeline_mode<synchronous>, transform_indices = @transform_1, window_bounds = array<i64: 32, 32>}, {pipeline_mode = #tpu.pipeline_mode<synchronous>, transform_indices = @transform_2, window_bounds = array<i64: 1, 32>}, {pipeline_mode = #tpu.pipeline_mode<synchronous>, transform_indices = @transform_3, window_bounds = array<i64: 1, 32>}, {pipeline_mode = #tpu.pipeline_mode<synchronous>, transform_indices = @transform_4, window_bounds = array<i64: 1, 1>}, {transform_indices = @transform_5, window_bounds = array<i64: 1, 8>}]} {
    %c0 = arith.constant 0 : index
    %c0_0 = arith.constant 0 : index
    %0 = vector.load %arg1[%c0, %c0_0] : memref<8x32xf32, #tpu.memory_space<vmem>>, vector<8x32xf32>
    %c0_1 = arith.constant 0 : index
    %c0_2 = arith.constant 0 : index
    %1 = vector.load %arg2[%c0_1, %c0_2] : memref<32x32xf32, #tpu.memory_space<vmem>>, vector<32x32xf32>
    %cst = arith.constant dense<0.000000e+00> : vector<8x32xf32>
    %2 = tpu.matmul %0, %1, %cst {dimension_numbers = #tpu.dot_dimension_numbers<[1], [0], [0], [1], [0, 0, 1, 1], [], []>} : vector<8x32xf32>, vector<32x32xf32>, vector<8x32xf32> -> vector<8x32xf32>
    %c0_3 = arith.constant 0 : index
    %c0_4 = arith.constant 0 : index
    %3 = vector.load %arg3[%c0_3, %c0_4] : memref<1x32xf32, #tpu.memory_space<vmem>>, vector<1x32xf32>
    %4 = vector.broadcast %3 : vector<1x32xf32> to vector<8x32xf32>
    %5 = arith.addf %2, %4 : vector<8x32xf32>
    %cst_5 = arith.constant 0.000000e+00 : f32
    %6 = vector.broadcast %cst_5 : f32 to vector<8x32xf32>
    %7 = arith.cmpf oge, %5, %6 : vector<8x32xf32>
    %cst_6 = arith.constant 0.229166672 : f32
    %8 = vector.broadcast %cst_6 : f32 to vector<8x32xf32>
    %9 = arith.mulf %5, %8 : vector<8x32xf32>
    %10 = arith.select %7, %5, %9 : vector<8x32xi1>, vector<8x32xf32>
    %c0_7 = arith.constant 0 : index
    %c0_8 = arith.constant 0 : index
    %11 = vector.load %arg4[%c0_7, %c0_8] : memref<1x32xf32, #tpu.memory_space<vmem>>, vector<1x32xf32>
    %12 = vector.broadcast %11 : vector<1x32xf32> to vector<8x32xf32>
    %13 = arith.mulf %10, %12 : vector<8x32xf32>
    %cst_9 = arith.constant dense<0.000000e+00> : vector<8xf32>
    %14 = vector.multi_reduction <add>, %13, %cst_9 [1] : vector<8x32xf32> to vector<8xf32>
    %15 = vector.shape_cast %14 : vector<8xf32> to vector<1x8xf32>
    %c0_10 = arith.constant 0 : index
    %c0_11 = arith.constant 0 : index
    %16 = vector.load %arg5[%c0_10, %c0_11] : memref<1x1xf32, #tpu.memory_space<vmem>>, vector<1x1xf32>
    %17 = vector.broadcast %16 : vector<1x1xf32> to vector<1x8xf32>
    %18 = arith.addf %15, %17 : vector<1x8xf32>
    %cst_12 = arith.constant 0.000000e+00 : f32
    %19 = vector.broadcast %cst_12 : f32 to vector<1x8xf32>
    %20 = arith.cmpf oge, %18, %19 : vector<1x8xf32>
    %cst_13 = arith.constant 0.229166672 : f32
    %21 = vector.broadcast %cst_13 : f32 to vector<1x8xf32>
    %22 = arith.mulf %18, %21 : vector<1x8xf32>
    %23 = arith.select %20, %18, %22 : vector<1x8xi1>, vector<1x8xf32>
    %c0_14 = arith.constant 0 : index
    %c0_15 = arith.constant 0 : index
    %24 = vector.load %arg6[%c0_14, %c0_15] : memref<1x8xf32, #tpu.memory_space<vmem>>, vector<1x8xf32>
    tpu.vector_store %arg6[%c0_14, %c0_15], %23 {strides = array<i32>} : memref<1x8xf32, #tpu.memory_space<vmem>>, vector<1x8xf32>,
    return
  }
  func.func @transform_0(%arg0: i32) -> (i32, i32) {
    %c0_i32 = arith.constant 0 : i32
    %c0_i32_0 = arith.constant 0 : i32
    return %arg0, %c0_i32 : i32, i32
  }
  func.func @transform_1(%arg0: i32) -> (i32, i32) {
    %c0_i32 = arith.constant 0 : i32
    %c0_i32_0 = arith.constant 0 : i32
    %c0_i32_1 = arith.constant 0 : i32
    return %c0_i32, %c0_i32_0 : i32, i32
  }
  func.func @transform_2(%arg0: i32) -> (i32, i32) {
    %c0_i32 = arith.constant 0 : i32
    %c0_i32_0 = arith.constant 0 : i32
    %c0_i32_1 = arith.constant 0 : i32
    return %c0_i32, %c0_i32_0 : i32, i32
  }
  func.func @transform_3(%arg0: i32) -> (i32, i32) {
    %c0_i32 = arith.constant 0 : i32
    %c0_i32_0 = arith.constant 0 : i32
    %c0_i32_1 = arith.constant 0 : i32
    return %c0_i32, %c0_i32_0 : i32, i32
  }
  func.func @transform_4(%arg0: i32) -> (i32, i32) {
    %c0_i32 = arith.constant 0 : i32
    %c0_i32_0 = arith.constant 0 : i32
    %c0_i32_1 = arith.constant 0 : i32
    return %c0_i32, %c0_i32_0 : i32, i32
  }
  func.func @transform_5(%arg0: i32) -> (i32, i32) {
    %c0_i32 = arith.constant 0 : i32
    %c0_i32_0 = arith.constant 0 : i32
    return %arg0, %c0_i32 : i32, i32
  }
}

</mosaic_0001>

<bundles_post_ra>
// kernel: tpu_custom_call.1
= control target key start
LH: loop header
LB: loop body
LE: loop exit
PB: predicated region body
PF: predicated region fallthrough
CT: control target
= control target key end

     0   :  { %s387_s0 = inlined_call_operand.hbm [shape: f32[8,32], index: 0, kind: input, shape index: {}]   ;;  %s388_s1 = inlined_call_operand.hbm [shape: f32[32,32], index: 1, kind: input, shape index: {}]   ;;  %s389_s2 = inlined_call_operand.vmem [shape: f32[1,32], index: 2, kind: input, shape index: {}]   ;;  %s390_s3 = inlined_call_operand.vmem [shape: f32[1,32], index: 3, kind: input, shape index: {}]   ;;  %s391_s4 = inlined_call_operand.<no memory space> [shape: f32[1,1], index: 4, kind: input, shape index: {}]   ;;  %s392_s5 = inlined_call_operand.hbm [shape: f32[1,8], index: 5, kind: output, shape index: {}]  }
   0x1   :  { %v10_v0 = vstv %s391_s4 }
   0x2   :  { %11 = vst [vmem:[#allocation2] sm:$0x1] %v10_v0 }
   0x3   :  { %12 = vsyncpa [#allocation4], 0 }
   0x4   :  { %13 = vsyncpa [#allocation7], 0 }
   0x5   :  { %14 = vsyncpa [#allocation5], 0  ;;  %s296_s20 = smov [#allocation3]   ;;  %s297_s22 = smov [#allocation6]  }
   0x6   :  { %s21_s21 = sshll.u32 %s296_s20, 4  ;;  %s30_s23 = sshll.u32 %s297_s22, 4  ;;  %s22_s21 = int_to_ptr.vmem [resolvable:$true] %s21_s21  ;;  %s338_s23 = int_to_ptr.vmem [resolvable:$true] %s30_s23 }
   0x7   :  { %s224_s26 = scalar_lea.hbm %s387_s0, 128 }
   0x8   :  { %p225_p0 = scmp.ne.s32.totalorder %s387_s0, %s224_s26  ;;  %p228_p1 = scmp.lt.u32.totalorder %s224_s26, %s387_s0 }
   0xa   :  { %p230_p2 = pnand %p228_p1, %p225_p0 }
   0xc   :  { %233 = shalt.err (!%p230_p2)
}
   0xd   :  { %s234_s30 = scalar_lea.vmem %s22_s21, 128  ;;  %p239_p4 = scmp.lt.s32.totalorder %s22_s21, %s22_s21 }
   0xe   :  { %p235_p3 = scmp.ne.s32.totalorder %s22_s21, %s234_s30  ;;  %p240_p5 = scmp.lt.s32.totalorder %s234_s30, %s234_s30 }
  0x10   :  { %p241_p6 = por %p240_p5, %p239_p4 }
  0x12   :  { %p242_p7 = pnand %p241_p6, %p235_p3 }
  0x14   :  { %245 = shalt.err (!%p242_p7)
}
  0x15   :  { %24 = dma.hbm_to_vmem [thread:$0]  %s387_s0, 128, %s22_s21, [#allocation4]  }
  0x16   :  { %s246_s10 = scalar_lea.hbm %s388_s1, 512 }
  0x17   :  { %p247_p8 = scmp.ne.s32.totalorder %s388_s1, %s246_s10  ;;  %p250_p9 = scmp.lt.u32.totalorder %s246_s10, %s388_s1 }
  0x19   :  { %p252_p10 = pnand %p250_p9, %p247_p8 }
  0x1b   :  { %255 = shalt.err (!%p252_p10)
}
  0x1c   :  { %s256_s15 = scalar_lea.vmem %s338_s23, 512  ;;  %p261_p12 = scmp.lt.s32.totalorder %s338_s23, %s338_s23 }
  0x1d   :  { %p257_p11 = scmp.ne.s32.totalorder %s338_s23, %s256_s15  ;;  %p262_p13 = scmp.lt.s32.totalorder %s256_s15, %s256_s15 }
  0x1f   :  { %p263_p0 = por %p262_p13, %p261_p12 }
  0x21   :  { %p264_p1 = pnand %p263_p0, %p257_p11 }
  0x23   :  { %267 = shalt.err (!%p264_p1)
}
  0x24   :  { %s298_s0 = smov 128   ;;  %s299_s16 = smov 8  }
  0x25   :  { %36 = dma.hbm_to_vmem [thread:$0]  %s388_s1, 512, %s338_s23, [#allocation7], %s298_s0, %s298_s0, %s299_s16  }
  0x26   :  { %290 = dma.done.wait [#allocation4], 128  }
  0x27   :  { %291 = vsyncadd [#allocation4], 4294967168 }
  0x28   :  { %292 = dma.done.wait [#allocation7], 512  }
  0x29   :  { %293 = vsyncadd [#allocation7], 4294966784  ;;  %v300_v1 = vmov 0.0|0.0   ;;  %vm301_vm0 = vmmov 0   ;;  %v302_v2 = vmov 0.0   ;;  %v50_v3 = vld [vmem:[#allocation6] sm:$0xff]  ;;  %v155_v21 = vlaneseq }
  0x2a   :  { %208 = vmatprep.subr.bf16.mxu0 %v300_v1  ;;  %205 = vmatprep.mubr.msk.f32.mxu0 %vm301_vm0, %v302_v2  ;;  %v51_v4 = vld [vmem:[#allocation6 + $0x8] sm:$0xff]  ;;  %v52_v5 = vld [vmem:[#allocation6 + $0x10] sm:$0xff]  ;;  %v53_v7 = vld [vmem:[#allocation6 + $0x18] sm:$0xff]  ;;  %vm61_vm1 = vcmask 261120   ;;  %v303_v10 = vmov 0   ;;  %vm171_vm4 = vcmask 57344  }
  0x2b   :  { %v209_v6 = vpack.c.bf16 %v51_v4, %v50_v3  ;;  %v212_v8 = vpack.c.bf16 %v53_v7, %v52_v5  ;;  %v49_v9 = vld [vmem:[#allocation3] sm:$0xff]  ;;  %223 = vset.pattern.permute.xlu0 %v303_v10  ;;  %v189_v11 = vld [vmem:[%s389_s2] ss:$0 sm:$0xff]  ;;  %v156_v22 = vshrl.u32 %v155_v21, 7  ;;  %v165_v25 = vand.u32 127, %v155_v21  ;;  %s304_s2 = smov [#allocation8]  }
  0x2c   :  { %v191_v16 = vld [vmem:[%s390_s3] ss:$0 sm:$0xff]  ;;  %s179_s22 = sshll.u32 %s304_s2, 4  ;;  %s180_s22 = int_to_ptr.vmem [resolvable:$true] %s179_s22 }
  0x2d   :  { %210 = vmatpush3.bf16.msra.mxu0 %v209_v6  ;;  %v149_v20 = vld [vmem:[#allocation2] sm:$0x1]  ;;  %v157_v24 = vsub.s32 0, %v156_v22  ;;  %v168_v29 = vsub.s32 %v165_v25, %v156_v22  ;;  %s268_s3 = scalar_lea.vmem %s180_s22, 16  ;;  %s272_s23 = scalar_lea.vmem %s180_s22, 32 }
  0x2e   :  { %211 = vmatprep.subr.bf16.mxu0 %v300_v1  ;;  %p269_p2 = scmp.ne.s32.totalorder %s180_s22, %s268_s3  ;;  %p273_p3 = scmp.lt.s32.totalorder %s180_s22, %s180_s22 }
  0x2f   :  { %p274_p4 = scmp.lt.s32.totalorder %s272_s23, %s268_s3 }
  0x31   :  { %213 = vmatpush3.bf16.msra.mxu0 %v212_v8  ;;  %p275_p5 = por %p274_p4, %p273_p3 }
  0x33   :  { %p276_p6 = pnand %p275_p5, %p269_p2 }
  0x34   :  { %206 = vmatmul.mubr.msk.f32.vlgmr.msra.gmra.mrb[0].mxu0 %vm61_vm1, %v49_v9 }
 0x107   :  { %v131_v12 = vpop.f32.mrb[0].mxu0 }
 0x108   :  { %v132_v13 = vadd.f32 %v189_v11, %v131_v12  ;;  %v207_v14 = vpop.f32.mrb[1].mxu0 }
 0x10a   :  { %v136_v15 = vmul.f32 0.22916667, %v132_v13  ;;  %vm135_vm2 = vcmp.ge.f32.partialorder %v132_v13, 0.0 }
 0x10c   :  { %v137_v17 = vsel %vm135_vm2, %v132_v13, %v136_v15 }
 0x10d   :  { %v145_v18 = vmul.f32 %v191_v16, %v137_v17 }
 0x10f   :  { %v146_v19 = vsel %vm61_vm1, %v145_v18, 0.0 }
 0x110   :  { %147 = vadd.xlane.f32.xlu0 %v146_v19 }
 0x126   :  { %152 = vperm.xlu0 %223, %v149_v20  }
 0x19d   :  { %v148_v23 = vpop.xlane.xlu0 %147 }
 0x1a5   :  { %v153_v26 = vpop.permute.xlu0 %152 }
 0x1a6   :  { %v158_v27 = vrot.slane %v153_v26, %v157_v24 }
 0x1a8   :  { %v159_v28 = vadd.f32 %v158_v27, %v148_v23 }
 0x1aa   :  { %vm160_vm3 = vcmp.ge.f32.partialorder %v159_v28, 0.0  ;;  %v161_v30 = vmul.f32 0.22916667, %v159_v28 }
 0x1ac   :  { %v162_v31 = vsel %vm160_vm3, %v159_v28, %v161_v30 }
 0x1ad   :  { %v169_v32 = vrot.slane %v162_v31, %v168_v29 }
 0x1af   :  { %172 = vst.msk [vmem:[#allocation8] sm:$0x1] %vm171_vm4, %v169_v32 }
 0x1b0   :  { %279 = shalt.err (!%p276_p6)
}
 0x1b1   :  { %s280_s26 = scalar_lea.hbm %s392_s5, 16 }
 0x1b2   :  { %p281_p7 = scmp.ne.s32.totalorder %s392_s5, %s280_s26  ;;  %p284_p8 = scmp.lt.u32.totalorder %s280_s26, %s392_s5 }
 0x1b4   :  { %p286_p9 = pnand %p284_p8, %p281_p7 }
 0x1b6   :  { %289 = shalt.err (!%p286_p9)
}
 0x1b7   :  { %182 = dma.vmem_to_hbm [thread:$0]  %s180_s22, 16, %s392_s5, [#allocation5]  }
 0x1b8   :  { %294 = dma.done.wait [#allocation5], 16  }
 0x1b9   :  { %295 = vsyncadd [#allocation5], 4294967280 }
 0x1ba   :  { %186 = vsyncpa [#allocation4], 1 }
 0x1bb   :  { %187 = vsyncpa [#allocation7], 1 }
 0x1bc   :  { %188 = vsyncpa [#allocation5], 1 }

</bundles_post_ra>
